<compile_context>
chip_gen: v5e
topology: v5e:2x2
jax: 0.10.0
libtpu: 0.0.40
codegen_flags: <defaults>
</compile_context>

<pallas_src>
import functools
import math

import jax
import jax.numpy as jnp
from jax.experimental import pallas as pl
from jax.experimental.pallas import tpu as pltpu


# ---------------------------------------------------------------- kernel ----

def _add_pe_kernel(x_ref, pe_ref, o_ref, *, batch: int):
    """x_ref/o_ref: (TS, B*D) lane-dense slabs; pe_ref: (TS, D).

    Single full-width store: pe is lane-tiled across the batch chunks in
    VMEM (never in HBM), so the store is one unmasked, lane-dense write.
    """
    pe = pe_ref[...]                                   # (TS, D)
    pe_slab = jnp.tile(pe, (1, batch)) if batch > 1 else pe   # (TS, B*D)
    o_ref[...] = (x_ref[...] + pe_slab).astype(o_ref.dtype)


# ----------------------------------------------------------- pe building ----

def make_positional_encoding(d_model: int, max_len: int = 5000) -> jnp.ndarray:
    """Deterministic construction of the `pe` buffer, shape (max_len, 1, d_model)."""
    position = jnp.arange(0, max_len, dtype=jnp.float32)[:, None]            # (max_len, 1)
    div_term = jnp.exp(
        jnp.arange(0, d_model, 2, dtype=jnp.float32) * (-math.log(10000.0) / d_model)
    )                                                                         # (ceil(d/2),)
    angles = position * div_term                                              # (max_len, ceil(d/2))
    pe = jnp.zeros((max_len, d_model), dtype=jnp.float32)
    pe = pe.at[:, 0::2].set(jnp.sin(angles))
    # Guard odd d_model (the PyTorch original errors there); even d_model identical.
    pe = pe.at[:, 1::2].set(jnp.cos(angles)[:, : d_model // 2])
    # unsqueeze(0).transpose(0, 1) -> (max_len, 1, d_model)
    return pe[:, None, :]


# ------------------------------------------------------------- heuristics ---

def _round_up(v: int, m: int) -> int:
    return ((v + m - 1) // m) * m


def _tpu_generation() -> int:
    """Best-effort TPU generation from the device kind string (0 if unknown)."""
    try:
        kind = jax.devices()[0].device_kind.lower()
    except Exception:
        return 0
    for tok, gen in (("7x", 7), ("v7", 7), ("tpu7", 7),
                     ("v6", 6), ("v5", 5), ("v4", 4)):
        if tok in kind:
            return gen
    return 0


def _target_block_bytes(gen: int) -> int:
    if gen >= 7:
        return 6 << 20      # ~3.2 TB/s per TC: amortize ~0.35us/step overhead
    if gen == 6:
        return 4 << 20      # fits 32 MiB default scope comfortably
    if gen == 5:
        return 3 << 20      # v5e default scope is 16 MiB; we also raise it
    return 4 << 20


def _choose_block_rows(seq_len: int, bytes_per_row: int, itemsize: int,
                       target_bytes: int, min_steps: int = 4) -> int:
    """Pick TS: ~target_bytes of x per tile, sublane-packed, >= min_steps blocks
    on long sequences so the pipeline (and v7x's two TCs) have work to overlap."""
    sub = max(8, 32 // max(1, itemsize))       # 8 f32 / 16 bf16 / 32 int8-fp8
    ts = max(sub, (target_bytes // max(1, bytes_per_row)) // sub * sub)
    if seq_len > min_steps * sub:
        ts = min(ts, _round_up(-(-seq_len // min_steps), sub))
    ts = min(ts, _round_up(seq_len, sub))      # never (much) larger than S
    return max(sub, ts)


# --------------------------------------------------------------- wrapper ----

def positional_encoding_forward(x: jnp.ndarray, pe: jnp.ndarray, *,
                                block_rows: int | None = None,
                                donate_x: bool = False) -> jnp.ndarray:
    """x: (S, B, D); pe: (max_len, 1, D). Returns x + pe[:S] (dtype of x)."""
    S, B, D = x.shape
    pe2 = pe[:S, 0, :].astype(x.dtype)   # (S, D); cast halves pe traffic for bf16 x
    x2 = x.reshape(S, B * D)             # free row-major flatten -> lane-dense rows

    itemsize = jnp.dtype(x.dtype).itemsize
    gen = _tpu_generation()
    ts = block_rows if block_rows is not None else _choose_block_rows(
        S, B * D * itemsize, itemsize, _target_block_bytes(gen))
    grid = (pl.cdiv(S, ts),)

    # Scoped-VMEM budget: 2x double-buffered x + 2x out + 2x pe blocks, plus
    # the in-kernel pe slab temp and headroom. Clamp to [32 MiB, 48 MiB]
    # (safe under v7x's 64 MiB physical; raises v5e's 16 MiB default).
    tile_x_bytes = ts * B * D * itemsize
    pe_tile_bytes = ts * D * itemsize
    vmem_limit = min(48 << 20,
                     max(32 << 20, 5 * tile_x_bytes + 2 * pe_tile_bytes + (8 << 20)))

    kernel = functools.partial(_add_pe_kernel, batch=B)
    out2 = pl.pallas_call(
        kernel,
        out_shape=jax.ShapeDtypeStruct((S, B * D), x.dtype),
        grid=grid,
        in_specs=[
            pl.BlockSpec((ts, B * D), lambda i: (i, 0)),   # x tile
            pl.BlockSpec((ts, D), lambda i: (i, 0)),       # pe tile (no batch copy in HBM)
        ],
        out_specs=pl.BlockSpec((ts, B * D), lambda i: (i, 0)),
        input_output_aliases=({0: 0} if donate_x else {}),
        compiler_params=pltpu.CompilerParams(
            dimension_semantics=("parallel",),   # shards S-tiles across TCs on v7x
            vmem_limit_bytes=vmem_limit,
        ),
    )(x2, pe2)
    return out2.reshape(S, B, D)


# ------------------------------------------------------------------ main ----

if __name__ == "__main__":
    d_model = 32
    max_len = 64      # small max_len for the synthetic test (module default 5000)
    seq_len = 8
    batch = 2

    pe = make_positional_encoding(d_model, max_len)

    key = jax.random.PRNGKey(0)
    x = jax.random.normal(key, (seq_len, batch, d_model), dtype=jnp.float32)

    out = positional_encoding_forward(x, pe)
    jax.block_until_ready(out)

    # sanity check against plain-JAX reference
    ref = x + pe[:seq_len]
    assert out.shape == (seq_len, batch, d_model)
    assert jnp.allclose(out, ref, atol=1e-6), "mismatch vs reference"

    # exercise multi-block tiling, including a ragged final block (40 rows, TS=16)
    x2 = jax.random.normal(jax.random.PRNGKey(1), (40, batch, d_model), dtype=jnp.float32)
    out2 = positional_encoding_forward(x2, pe, block_rows=16)
    jax.block_until_ready(out2)
    assert jnp.allclose(out2, x2 + pe[:40], atol=1e-6), "tiled mismatch vs reference"

    # bf16 path: exercises the pe dtype cast and the 16-row sublane packing
    x3 = jax.random.normal(jax.random.PRNGKey(2), (48, batch, d_model),
                           dtype=jnp.bfloat16)
    out3 = positional_encoding_forward(x3, pe)
    jax.block_until_ready(out3)
    ref3 = (x3.astype(jnp.float32) + pe[:48]).astype(jnp.float32)
    assert jnp.allclose(out3.astype(jnp.float32), ref3, atol=5e-2), "bf16 mismatch"

    print("KERNEL_OK")
</pallas_src>

<mosaic_0001>
module attributes {stable_mosaic.version = 11 : i64} {
  func.func @_add_pe_kernel(%arg0: i32, %arg1: memref<8x64xf32, #tpu.memory_space<vmem>>, %arg2: memref<8x32xf32, #tpu.memory_space<vmem>>, %arg3: memref<8x64xf32, #tpu.memory_space<vmem>>) attributes {dimension_semantics = [#tpu.dimension_semantics<parallel>], iteration_bounds = array<i64: 1>, scalar_prefetch = 0 : i64, scratch_operands = 0 : i64, tpu.core_type = #tpu.core_type<tc>, window_params = [{transform_indices = @transform_0, window_bounds = array<i64: 8, 64>}, {transform_indices = @transform_1, window_bounds = array<i64: 8, 32>}, {transform_indices = @transform_2, window_bounds = array<i64: 8, 64>}]} {
    %c0 = arith.constant 0 : index
    %c0_0 = arith.constant 0 : index
    %0 = vector.load %arg2[%c0, %c0_0] : memref<8x32xf32, #tpu.memory_space<vmem>>, vector<8x32xf32>
    %1 = tpu.concatenate %0, %0 in 1 : vector<8x32xf32>, vector<8x32xf32> -> vector<8x64xf32>
    %c0_1 = arith.constant 0 : index
    %c0_2 = arith.constant 0 : index
    %2 = vector.load %arg1[%c0_1, %c0_2] : memref<8x64xf32, #tpu.memory_space<vmem>>, vector<8x64xf32>
    %3 = arith.addf %2, %1 : vector<8x64xf32>
    %c0_3 = arith.constant 0 : index
    %c0_4 = arith.constant 0 : index
    %4 = vector.load %arg3[%c0_3, %c0_4] : memref<8x64xf32, #tpu.memory_space<vmem>>, vector<8x64xf32>
    tpu.vector_store %arg3[%c0_3, %c0_4], %3 {strides = array<i32>} : memref<8x64xf32, #tpu.memory_space<vmem>>, vector<8x64xf32>,
    return
  }
  func.func @transform_0(%arg0: i32) -> (i32, i32) {
    %c0_i32 = arith.constant 0 : i32
    %c0_i32_0 = arith.constant 0 : i32
    return %arg0, %c0_i32 : i32, i32
  }
  func.func @transform_1(%arg0: i32) -> (i32, i32) {
    %c0_i32 = arith.constant 0 : i32
    %c0_i32_0 = arith.constant 0 : i32
    return %arg0, %c0_i32 : i32, i32
  }
  func.func @transform_2(%arg0: i32) -> (i32, i32) {
    %c0_i32 = arith.constant 0 : i32
    %c0_i32_0 = arith.constant 0 : i32
    return %arg0, %c0_i32 : i32, i32
  }
}

</mosaic_0001>

<bundles_post_ra>
// kernel: tpu_custom_call.1
= control target key start
LH: loop header
LB: loop body
LE: loop exit
PB: predicated region body
PF: predicated region fallthrough
CT: control target
= control target key end

     0   :  { %7 = vsyncpa [#allocation3], 0  ;;  %s179_s0 = inlined_call_operand.hbm [shape: f32[8,64], index: 0, kind: input, shape index: {}]   ;;  %s180_s1 = inlined_call_operand.hbm [shape: f32[8,32], index: 1, kind: input, shape index: {}]   ;;  %s181_s2 = inlined_call_operand.hbm [shape: f32[8,64], index: 2, kind: output, shape index: {}]  }
   0x1   :  { %8 = vsyncpa [#allocation6], 0 }
   0x2   :  { %9 = vsyncpa [#allocation4], 0  ;;  %s15_s11 = sshll.u32 %s179_s0, 4  ;;  %s151_s12 = smov [#allocation2]   ;;  %s16_s11 = int_to_ptr.hbm [resolvable:$true] %s15_s11 }
   0x3   :  { %s17_s13 = sshll.u32 %s151_s12, 4  ;;  %s26_s16 = sshll.u32 %s180_s1, 4  ;;  %s18_s13 = int_to_ptr.vmem [resolvable:$true] %s17_s13  ;;  %s27_s16 = int_to_ptr.hbm [resolvable:$true] %s26_s16 }
   0x4   :  { %20 = dma.hbm_to_vmem [thread:$0]  %s16_s11, 128, %s18_s13, [#allocation3]  }
   0x5   :  { %s152_s17 = smov [#allocation5]  }
   0x6   :  { %s28_s18 = sshll.u32 %s152_s17, 4  ;;  %s29_s18 = int_to_ptr.vmem [resolvable:$true] %s28_s18 }
   0x7   :  { %31 = dma.hbm_to_vmem [thread:$0]  %s27_s16, 128, %s29_s18, [#allocation6]  }
   0x8   :  { %145 = dma.done.wait [#allocation3], 128  }
   0x9   :  { %146 = vsyncadd [#allocation3], 4294967168 }
   0xa   :  { %147 = dma.done.wait [#allocation6], 128  }
   0xb   :  { %148 = vsyncadd [#allocation6], 4294967168  ;;  %v40_v0 = vld [vmem:[#allocation5] sm:$0xff]  ;;  %s153_s0 = smov 32   ;;  %vm45_vm0 = vcmask 261120   ;;  %v47_v1 = vld [vmem:[#allocation2] sm:$0xff] }
   0xc   :  { %42 = vrot.lane.b32.xlu0 %v40_v0, %s153_s0  ;;  %s154_s19 = smov [#allocation7]   ;;  %s58_s1 = sshll.u32 %s181_s2, 4  ;;  %vm49_vm1 = vcmask 523264   ;;  %s59_s1 = int_to_ptr.hbm [resolvable:$true] %s58_s1 }
   0xd   :  { %s56_s20 = sshll.u32 %s154_s19, 4  ;;  %s57_s20 = int_to_ptr.vmem [resolvable:$true] %s56_s20 }
  0x7e   :  { %v43_v2 = vpop.permute.xlu0 %42 }
  0x7f   :  { %v46_v3 = vsel %vm45_vm0, %v40_v0, %v43_v2 }
  0x80   :  { %v48_v4 = vadd.f32 %v47_v1, %v46_v3 }
  0x82   :  { %50 = vst.msk [vmem:[#allocation7] sm:$0xff] %vm49_vm1, %v48_v4 }
  0x83   :  { %61 = dma.vmem_to_hbm [thread:$0]  %s57_s20, 128, %s59_s1, [#allocation4]  }
  0x84   :  { %149 = dma.done.wait [#allocation4], 128  }
  0x85   :  { %150 = vsyncadd [#allocation4], 4294967168 }
  0x86   :  { %66 = vsyncpa [#allocation3], 1 }
  0x87   :  { %67 = vsyncpa [#allocation6], 1 }
  0x88   :  { %68 = vsyncpa [#allocation4], 1 }

</bundles_post_ra>
